<compile_context>
chip_gen: v6e
topology: v6e:2x2x1
jax: 0.10.0
libtpu: 0.0.40
codegen_flags: <defaults>
</compile_context>

<pallas_src>
import jax
import jax.numpy as jnp
from jax.experimental import pallas as pl
from jax.experimental.pallas import tpu as pltpu

IN_DIM = 23
OUT_DIM = 8
LAYER_DIMS = [(23, 20), (20, 15), (15, 10), (10, 8)]
N_LAYERS = len(LAYER_DIMS)
PAD = 128    # lane width for all layer *outputs* (hidden dims zero-padded)
KPAD = 32    # sublane padding for hidden/out weights (max hidden fan_in is 20)


def mlp_kernel(x_ref, w0_ref, wr_ref, b_ref, o_ref):
    """One batch tile of the 4-layer MLP + log_softmax.

    x_ref  : (TB, 23) f32        batch tile, unpadded features
    w0_ref : (23, 128) bf16      layer-0 weight, out-lanes zero-padded to 128
    wr_ref : (3, 32, 128) bf16   layers 1..3 weights, (in, out) zero-padded
    b_ref  : (4, 1, 128) f32     bias stack, zero-padded
    o_ref  : (TB, 8) f32         log-probs (narrow, no padded lanes written)
    """
    # Layer 0: bf16 MXU feed with K=23 (Mosaic pads the contraction), f32 acc.
    xb = x_ref[...].astype(jnp.bfloat16)                                  # (TB, 23)
    a = jnp.dot(xb, w0_ref[...], preferred_element_type=jnp.float32) + b_ref[0]
    h = jnp.maximum(a, 0.0)                                               # (TB, 128) f32

    # Layers 1..3: only the first KPAD lanes of h can be non-zero (hidden dims
    # <= 20), so dot the 32-lane slice against the (32, 128) weight tiles.
    for l in range(1, N_LAYERS):
        hb = h[:, :KPAD].astype(jnp.bfloat16)                             # (TB, 32) bf16
        a = jnp.dot(hb, wr_ref[l - 1], preferred_element_type=jnp.float32) + b_ref[l]
        if l < N_LAYERS - 1:
            h = jnp.maximum(a, 0.0)

    # log_softmax over the 8 real logits only (padded lanes never enter the
    # normalizer and are never written back).
    logits = a[:, :OUT_DIM]                                               # (TB, 8) f32
    m = jnp.max(logits, axis=-1, keepdims=True)
    shifted = logits - m
    lse = jnp.log(jnp.sum(jnp.exp(shifted), axis=-1, keepdims=True))
    o_ref[...] = shifted - lse


def pack_params(params):
    """Pad/cast parameters into three kernel operands.

    Returns:
      w0     : (23, 128) bf16   layer-0 weight (no sublane pad needed)
      w_rest : (3, 32, 128) bf16 hidden/out weights, sublane-padded to 32
      b_stack: (4, 1, 128) f32   biases
    """
    (w1, b1) = params[0]
    w0 = (jnp.zeros((IN_DIM, PAD), jnp.float32)
          .at[:, :w1.shape[1]].set(w1).astype(jnp.bfloat16))
    bs = [jnp.zeros((1, PAD), jnp.float32).at[:, :b1.shape[-1]].set(b1.reshape(1, -1))]
    ws = []
    for (w, b) in params[1:]:
        fi, fo = w.shape
        ws.append(jnp.zeros((KPAD, PAD), jnp.float32)
                  .at[:fi, :fo].set(w).astype(jnp.bfloat16))
        bs.append(jnp.zeros((1, PAD), jnp.float32).at[:, :fo].set(b.reshape(1, -1)))
    return w0, jnp.stack(ws), jnp.stack(bs)


def net_forward(x, w0, w_rest, b_stack, *, block_b=4096, min_tiles=4):
    """Forward pass. x: (B, 23) f32 -> (B, 8) f32 log-probs."""
    assert x.shape[1] == IN_DIM
    B = x.shape[0]

    # Tile selection: multiple of 8 (sublane); large enough to amortize the
    # ~0.35us/step overhead, but capped so the "parallel" batch axis produces
    # >= min_tiles grid steps (keeps both v7x TensorCores busy and the
    # pipeline primed).  Per-step VMEM at TB=4096 is ~1 MiB double-buffered —
    # far under v7x's 64 MiB per-TC (and v5e/v6e's 128 MiB).
    Bp8 = -(-B // 8) * 8
    TB = min(block_b, max(8, -(-Bp8 // min_tiles)))
    TB = -(-TB // 8) * 8
    Bp = -(-Bp8 // TB) * TB
    grid = (Bp // TB,)

    # Only the batch dim is (conditionally) padded; features stay at 23 lanes
    # and are zero-extended / cast inside the kernel, not in HBM.
    xin = x if Bp == B else jnp.zeros((Bp, IN_DIM), x.dtype).at[:B].set(x)

    flops = 2 * B * sum(i * o for i, o in LAYER_DIMS)
    bytes_accessed = (xin.size * xin.dtype.itemsize
                      + w0.size * w0.dtype.itemsize
                      + w_rest.size * w_rest.dtype.itemsize
                      + b_stack.size * b_stack.dtype.itemsize
                      + Bp * OUT_DIM * 4)
    cost = pl.CostEstimate(flops=flops,
                           transcendentals=B * (OUT_DIM + 1),
                           bytes_accessed=bytes_accessed)

    out = pl.pallas_call(
        mlp_kernel,
        out_shape=jax.ShapeDtypeStruct((Bp, OUT_DIM), jnp.float32),
        grid=grid,
        in_specs=[
            pl.BlockSpec((TB, IN_DIM), lambda i: (i, 0)),            # x: batch-tiled, 23 lanes
            pl.BlockSpec((IN_DIM, PAD), lambda i: (0, 0)),           # layer-0 weight, resident
            pl.BlockSpec((N_LAYERS - 1, KPAD, PAD), lambda i: (0, 0, 0)),  # weights, resident
            pl.BlockSpec((N_LAYERS, 1, PAD), lambda i: (0, 0, 0)),   # biases, resident
        ],
        out_specs=pl.BlockSpec((TB, OUT_DIM), lambda i: (i, 0)),     # narrow (TB, 8) writeback
        compiler_params=pltpu.CompilerParams(
            dimension_semantics=("parallel",),      # 2-TC sharding on v7x
            vmem_limit_bytes=32 * 1024 * 1024),
        cost_estimate=cost,
    )(xin, w0, w_rest, b_stack)

    return out[:B]


def init_params(key):
    """Deterministic init mirroring nn.Linear shapes (stored as (in, out))."""
    params = []
    for (fan_in, fan_out) in LAYER_DIMS:
        key, kw, kb = jax.random.split(key, 3)
        bound = 1.0 / jnp.sqrt(fan_in)
        w = jax.random.uniform(kw, (fan_in, fan_out), jnp.float32, -bound, bound)
        b = jax.random.uniform(kb, (1, fan_out), jnp.float32, -bound, bound)
        params.append((w, b))
    return params


def reference_forward(x, params):
    """Plain-JAX reference matching the kernel's bf16-fed / f32-accum math."""
    def bf16(a):
        return a.astype(jnp.bfloat16).astype(jnp.float32)

    h = x
    for i, (w, b) in enumerate(params):
        h = jnp.dot(bf16(h), bf16(w)) + b.reshape(1, -1)
        if i < len(params) - 1:
            h = jnp.maximum(h, 0.0)
    return jax.nn.log_softmax(h, axis=1)


if __name__ == "__main__":
    key = jax.random.PRNGKey(0)
    key, kx = jax.random.split(key)

    B = 200  # deliberately not a multiple of the batch tile -> exercises batch pad
    x = jax.random.normal(kx, (B, IN_DIM), dtype=jnp.float32)
    params = init_params(key)
    w0, w_rest, b_stack = pack_params(params)

    out = net_forward(x, w0, w_rest, b_stack)   # multi-step grid via min_tiles=4
    out = jax.block_until_ready(out)

    ref = reference_forward(x, params)
    assert out.shape == (B, OUT_DIM)
    assert bool(jnp.all(jnp.isfinite(out)))
    assert jnp.allclose(out, ref, atol=1e-4, rtol=1e-4), \
        float(jnp.max(jnp.abs(out - ref)))

    print("KERNEL_OK")
</pallas_src>

<mosaic_0001>
module attributes {stable_mosaic.version = 11 : i64} {
  func.func @mlp_kernel(%arg0: i32, %arg1: memref<56x23xf32, #tpu.memory_space<vmem>>, %arg2: memref<23x128xbf16, #tpu.memory_space<vmem>>, %arg3: memref<3x32x128xbf16, #tpu.memory_space<vmem>>, %arg4: memref<4x1x128xf32, #tpu.memory_space<vmem>>, %arg5: memref<56x8xf32, #tpu.memory_space<vmem>>) attributes {dimension_semantics = [#tpu.dimension_semantics<parallel>], iteration_bounds = array<i64: 4>, scalar_prefetch = 0 : i64, scratch_operands = 0 : i64, tpu.core_type = #tpu.core_type<tc>, window_params = [{transform_indices = @transform_0, window_bounds = array<i64: 56, 23>}, {pipeline_mode = #tpu.pipeline_mode<synchronous>, transform_indices = @transform_1, window_bounds = array<i64: 23, 128>}, {pipeline_mode = #tpu.pipeline_mode<synchronous>, transform_indices = @transform_2, window_bounds = array<i64: 3, 32, 128>}, {pipeline_mode = #tpu.pipeline_mode<synchronous>, transform_indices = @transform_3, window_bounds = array<i64: 4, 1, 128>}, {transform_indices = @transform_4, window_bounds = array<i64: 56, 8>}]} {
    %c0 = arith.constant 0 : index
    %c0_0 = arith.constant 0 : index
    %0 = vector.load %arg1[%c0, %c0_0] : memref<56x23xf32, #tpu.memory_space<vmem>>, vector<56x23xf32>
    %1 = arith.truncf %0 : vector<56x23xf32> to vector<56x23xbf16>
    %c0_1 = arith.constant 0 : index
    %c0_2 = arith.constant 0 : index
    %2 = vector.load %arg2[%c0_1, %c0_2] : memref<23x128xbf16, #tpu.memory_space<vmem>>, vector<23x128xbf16>
    %cst = arith.constant dense<0.000000e+00> : vector<56x128xf32>
    %3 = tpu.matmul %1, %2, %cst {dimension_numbers = #tpu.dot_dimension_numbers<[1], [0], [0], [1], [0, 0, 1, 1], [], []>} : vector<56x23xbf16>, vector<23x128xbf16>, vector<56x128xf32> -> vector<56x128xf32>
    %c0_3 = arith.constant 0 : index
    %c0_4 = arith.constant 0 : index
    %c0_5 = arith.constant 0 : index
    %4 = vector.load %arg4[%c0_3, %c0_4, %c0_5] : memref<4x1x128xf32, #tpu.memory_space<vmem>>, vector<1x1x128xf32>
    %5 = vector.shape_cast %4 : vector<1x1x128xf32> to vector<1x128xf32>
    %6 = vector.broadcast %5 : vector<1x128xf32> to vector<56x128xf32>
    %7 = arith.addf %3, %6 : vector<56x128xf32>
    %cst_6 = arith.constant 0.000000e+00 : f32
    %8 = vector.broadcast %cst_6 : f32 to vector<56x128xf32>
    %9 = arith.maximumf %7, %8 : vector<56x128xf32>
    %10 = vector.extract_strided_slice %9 {offsets = [0, 0], sizes = [56, 32], strides = [1, 1]} : vector<56x128xf32> to vector<56x32xf32>
    %11 = arith.truncf %10 : vector<56x32xf32> to vector<56x32xbf16>
    %c0_7 = arith.constant 0 : index
    %c0_8 = arith.constant 0 : index
    %c0_9 = arith.constant 0 : index
    %12 = vector.load %arg3[%c0_7, %c0_8, %c0_9] : memref<3x32x128xbf16, #tpu.memory_space<vmem>>, vector<1x32x128xbf16>
    %13 = vector.shape_cast %12 : vector<1x32x128xbf16> to vector<32x128xbf16>
    %cst_10 = arith.constant dense<0.000000e+00> : vector<56x128xf32>
    %14 = tpu.matmul %11, %13, %cst_10 {dimension_numbers = #tpu.dot_dimension_numbers<[1], [0], [0], [1], [0, 0, 1, 1], [], []>} : vector<56x32xbf16>, vector<32x128xbf16>, vector<56x128xf32> -> vector<56x128xf32>
    %c1 = arith.constant 1 : index
    %c0_11 = arith.constant 0 : index
    %c0_12 = arith.constant 0 : index
    %15 = vector.load %arg4[%c1, %c0_11, %c0_12] : memref<4x1x128xf32, #tpu.memory_space<vmem>>, vector<1x1x128xf32>
    %16 = vector.shape_cast %15 : vector<1x1x128xf32> to vector<1x128xf32>
    %17 = vector.broadcast %16 : vector<1x128xf32> to vector<56x128xf32>
    %18 = arith.addf %14, %17 : vector<56x128xf32>
    %cst_13 = arith.constant 0.000000e+00 : f32
    %19 = vector.broadcast %cst_13 : f32 to vector<56x128xf32>
    %20 = arith.maximumf %18, %19 : vector<56x128xf32>
    %21 = vector.extract_strided_slice %20 {offsets = [0, 0], sizes = [56, 32], strides = [1, 1]} : vector<56x128xf32> to vector<56x32xf32>
    %22 = arith.truncf %21 : vector<56x32xf32> to vector<56x32xbf16>
    %c1_14 = arith.constant 1 : index
    %c0_15 = arith.constant 0 : index
    %c0_16 = arith.constant 0 : index
    %23 = vector.load %arg3[%c1_14, %c0_15, %c0_16] : memref<3x32x128xbf16, #tpu.memory_space<vmem>>, vector<1x32x128xbf16>
    %24 = vector.shape_cast %23 : vector<1x32x128xbf16> to vector<32x128xbf16>
    %cst_17 = arith.constant dense<0.000000e+00> : vector<56x128xf32>
    %25 = tpu.matmul %22, %24, %cst_17 {dimension_numbers = #tpu.dot_dimension_numbers<[1], [0], [0], [1], [0, 0, 1, 1], [], []>} : vector<56x32xbf16>, vector<32x128xbf16>, vector<56x128xf32> -> vector<56x128xf32>
    %c2 = arith.constant 2 : index
    %c0_18 = arith.constant 0 : index
    %c0_19 = arith.constant 0 : index
    %26 = vector.load %arg4[%c2, %c0_18, %c0_19] : memref<4x1x128xf32, #tpu.memory_space<vmem>>, vector<1x1x128xf32>
    %27 = vector.shape_cast %26 : vector<1x1x128xf32> to vector<1x128xf32>
    %28 = vector.broadcast %27 : vector<1x128xf32> to vector<56x128xf32>
    %29 = arith.addf %25, %28 : vector<56x128xf32>
    %cst_20 = arith.constant 0.000000e+00 : f32
    %30 = vector.broadcast %cst_20 : f32 to vector<56x128xf32>
    %31 = arith.maximumf %29, %30 : vector<56x128xf32>
    %32 = vector.extract_strided_slice %31 {offsets = [0, 0], sizes = [56, 32], strides = [1, 1]} : vector<56x128xf32> to vector<56x32xf32>
    %33 = arith.truncf %32 : vector<56x32xf32> to vector<56x32xbf16>
    %c2_21 = arith.constant 2 : index
    %c0_22 = arith.constant 0 : index
    %c0_23 = arith.constant 0 : index
    %34 = vector.load %arg3[%c2_21, %c0_22, %c0_23] : memref<3x32x128xbf16, #tpu.memory_space<vmem>>, vector<1x32x128xbf16>
    %35 = vector.shape_cast %34 : vector<1x32x128xbf16> to vector<32x128xbf16>
    %cst_24 = arith.constant dense<0.000000e+00> : vector<56x128xf32>
    %36 = tpu.matmul %33, %35, %cst_24 {dimension_numbers = #tpu.dot_dimension_numbers<[1], [0], [0], [1], [0, 0, 1, 1], [], []>} : vector<56x32xbf16>, vector<32x128xbf16>, vector<56x128xf32> -> vector<56x128xf32>
    %c3 = arith.constant 3 : index
    %c0_25 = arith.constant 0 : index
    %c0_26 = arith.constant 0 : index
    %37 = vector.load %arg4[%c3, %c0_25, %c0_26] : memref<4x1x128xf32, #tpu.memory_space<vmem>>, vector<1x1x128xf32>
    %38 = vector.shape_cast %37 : vector<1x1x128xf32> to vector<1x128xf32>
    %39 = vector.broadcast %38 : vector<1x128xf32> to vector<56x128xf32>
    %40 = arith.addf %36, %39 : vector<56x128xf32>
    %41 = vector.extract_strided_slice %40 {offsets = [0, 0], sizes = [56, 8], strides = [1, 1]} : vector<56x128xf32> to vector<56x8xf32>
    %cst_27 = arith.constant dense<0xFF800000> : vector<56xf32>
    %42 = vector.multi_reduction <maximumf>, %41, %cst_27 [1] : vector<56x8xf32> to vector<56xf32>
    %43 = vector.shape_cast %42 : vector<56xf32> to vector<56x1xf32>
    %44 = vector.broadcast %43 : vector<56x1xf32> to vector<56x8xf32>
    %45 = arith.subf %41, %44 : vector<56x8xf32>
    %46 = math.exp %45 : vector<56x8xf32>
    %cst_28 = arith.constant dense<0.000000e+00> : vector<56xf32>
    %47 = vector.multi_reduction <add>, %46, %cst_28 [1] : vector<56x8xf32> to vector<56xf32>
    %48 = vector.shape_cast %47 : vector<56xf32> to vector<56x1xf32>
    %49 = math.log %48 : vector<56x1xf32>
    %50 = vector.broadcast %49 : vector<56x1xf32> to vector<56x8xf32>
    %51 = arith.subf %45, %50 : vector<56x8xf32>
    %c0_29 = arith.constant 0 : index
    %c0_30 = arith.constant 0 : index
    %52 = vector.load %arg5[%c0_29, %c0_30] : memref<56x8xf32, #tpu.memory_space<vmem>>, vector<56x8xf32>
    tpu.vector_store %arg5[%c0_29, %c0_30], %51 {strides = array<i32>} : memref<56x8xf32, #tpu.memory_space<vmem>>, vector<56x8xf32>,
    return
  }
  func.func @transform_0(%arg0: i32) -> (i32, i32) {
    %c0_i32 = arith.constant 0 : i32
    %c0_i32_0 = arith.constant 0 : i32
    return %arg0, %c0_i32 : i32, i32
  }
  func.func @transform_1(%arg0: i32) -> (i32, i32) {
    %c0_i32 = arith.constant 0 : i32
    %c0_i32_0 = arith.constant 0 : i32
    %c0_i32_1 = arith.constant 0 : i32
    return %c0_i32, %c0_i32_0 : i32, i32
  }
  func.func @transform_2(%arg0: i32) -> (i32, i32, i32) {
    %c0_i32 = arith.constant 0 : i32
    %c0_i32_0 = arith.constant 0 : i32
    %c0_i32_1 = arith.constant 0 : i32
    %c0_i32_2 = arith.constant 0 : i32
    return %c0_i32, %c0_i32_0, %c0_i32_1 : i32, i32, i32
  }
  func.func @transform_3(%arg0: i32) -> (i32, i32, i32) {
    %c0_i32 = arith.constant 0 : i32
    %c0_i32_0 = arith.constant 0 : i32
    %c0_i32_1 = arith.constant 0 : i32
    %c0_i32_2 = arith.constant 0 : i32
    return %c0_i32, %c0_i32_0, %c0_i32_1 : i32, i32, i32
  }
  func.func @transform_4(%arg0: i32) -> (i32, i32) {
    %c0_i32 = arith.constant 0 : i32
    %c0_i32_0 = arith.constant 0 : i32
    return %arg0, %c0_i32 : i32, i32
  }
}

</mosaic_0001>

<bundles_post_ra>
// kernel: tpu_custom_call.1
= control target key start
LH: loop header
LB: loop body
LE: loop exit
PB: predicated region body
PF: predicated region fallthrough
CT: control target
= control target key end

     0   :  { %s999_s15 = smov 0   ;;  %s1120_s0 = inlined_call_operand.vmem [shape: f32[224,23], index: 0, kind: input, shape index: {}]   ;;  %s1121_s1 = inlined_call_operand.vmem [shape: bf16[23,128], index: 1, kind: input, shape index: {}]   ;;  %s1122_s2 = inlined_call_operand.vmem [shape: bf16[3,32,128], index: 2, kind: input, shape index: {}]   ;;  %s1123_s3 = inlined_call_operand.vmem [shape: f32[4,1,128], index: 3, kind: input, shape index: {}]   ;;  %s1124_s4 = inlined_call_operand.vmem [shape: f32[224,8], index: 4, kind: output, shape index: {}]  }
   0x1 LB: > { %s800_s16 = sadd.s32 4294967295, %s971_s15   ;;  %p804_p0 = scmp.ge.s32.totalorder %s971_s15, 1  ;;  %s971_s15 = sphi %s999_s15, %s14_s15  }
   0x2   : > { %p163_p1 = scmp.lt.s32.totalorder %s971_s15, 5 }
   0x4   : > { %p164_p2 = pnand %p804_p0, %p163_p1 }
   0x5   : > { %s189_s19 = smul.u32 (!%p164_p2), 7, %s800_s16 }
   0x6   : > { %167 = sbr.rel (%p164_p2) target bundleno = 1167 (0x48f), region = 36 }
   0x7   : > { %p190_p3 = scmp.lt.s32.totalorder (!%p164_p2), %s189_s19, 27 }
   0xb   : > { %v929_v0 = vld [vmem:[%s1121_s1 + $0x8] ss:$0 sps:$4 sm:$0xff]   ;;  %vm245_vm0 = vcmask 1042432   ;;  %vm246_vm1 = vcmask 1043456   ;;  %v973_v1 = vmov 65535   ;;  %v930_v5 = vld [vmem:[%s1121_s1] sm:$0xff]  }
   0xc   : > { %v247_v2 = vsel %vm245_vm0, 4294967295, %v973_v1  ;;  %s1126_s19 = smov (!%p190_p3, %s189_s19), 27  ;;  %vm232_vm2 = vcmask 187392   ;;  %v931_v17 = vld [vmem:[%s1122_s2 + $0x8] sm:$0xff]   ;;  %v932_v18 = vld [vmem:[%s1122_s2] sm:$0xff]   ;;  %v933_v19 = vld [vmem:[%s1122_s2 + $0x18] sm:$0xff]  }
   0xd   : > { %v248_v3 = vsel %vm246_vm1, %v247_v2, 0  ;;  %s805_s22 = sshll.u32 %s1126_s19, 3  ;;  %884 = vmatprep.subr.bf16.mxu1 %v931_v17  ;;  %v807_v22 = vld [vmem:[%s1123_s3] ss:$0 sm:$0xff]  ;;  %vm351_vm3 = vcmask 261120   ;;  %v934_v47 = vld [vmem:[%s1122_s2 + $0x10] sm:$0xff]  }
   0xe   : > { %v250_v4 = vand.u32 %v929_v0, %v248_v3  ;;  %s193_s25 = scalar_lea.vmem %s1120_s0, %s805_s22  ;;  %885 = vmatpush3.bf16.msra.mxu1 %v931_v17  ;;  %v935_v48 = vld [vmem:[%s1122_s2 + $0x28] sm:$0xff]   ;;  %v815_v51 = vld [vmem:[%s1123_s3 + $0x1] ss:$0 sm:$0xff]  ;;  %vm652_vm4 = vcmask 64512  }
   0xf   : > { %v202_v6 = vld [vmem:[%s193_s25] sm:$0xff]  ;;  %v203_v7 = vld [vmem:[%s193_s25 + $0x8] sm:$0xff]  ;;  %v204_v8 = vld [vmem:[%s193_s25 + $0x10] sm:$0xff]  ;;  %886 = vmatprep.subr.bf16.mxu1 %v932_v18 }
  0x10   : > { %872 = vmatprep.subr.bf16.mxu0 %v250_v4  ;;  %v209_v9 = vpack.c.bf16 %v203_v7, %v202_v6  ;;  %v205_v10 = vld [vmem:[%s193_s25 + $0x18] sm:$0xff]  ;;  %v206_v11 = vld [vmem:[%s193_s25 + $0x20] sm:$0xff]  ;;  %v207_v12 = vld [vmem:[%s193_s25 + $0x28] sm:$0xff] }
  0x11   : > { %873 = vmatpush3.bf16.msra.mxu0 %v250_v4  ;;  %v210_v13 = vpack.c.bf16 %v205_v10, %v204_v8  ;;  %v211_v14 = vpack.c.bf16 %v207_v12, %v206_v11  ;;  %v208_v15 = vld [vmem:[%s193_s25 + $0x30] sm:$0xff]  ;;  %v936_v12 = vld [vmem:[%s1122_s2 + $0x20] sm:$0xff]   ;;  %s199_s25 = scalar_lea.vmem %s1124_s4, %s805_s22 }
  0x12   : > { %874 = vmatprep.subr.bf16.mxu0 %v930_v5  ;;  %876 = vmatprep.mubr.msk.bf16.mxu0 %vm232_vm2, %v209_v9  ;;  %v212_v16 = vpack.c.bf16 %v208_v15, %v208_v15  ;;  %v827_v15 = vld [vmem:[%s1123_s3 + $0x2] ss:$0 sm:$0xff] }
  0x13   : > { %887 = vmatpush3.bf16.msra.mxu1 %v932_v18 }
  0x14   : > { %908 = vmatprep.subr.bf16.mxu1 %v935_v48 }
  0x15   : > { %875 = vmatpush3.bf16.msra.mxu0 %v930_v5 }
  0x16   : > { %896 = vmatprep.subr.bf16.mxu0 %v933_v19 }
  0x18   : > { %877 = vmatmul.mubr.msk.bf16.vlgmr.msra.gmra.mxu0 %vm232_vm2, %v210_v13 }
  0x19   : > { %880 = vmatprep.mubr.msk.bf16.mxu0 %vm232_vm2, %v211_v14  ;;  %897 = vmatpush3.bf16.msra.mxu0 %v933_v19 }
  0x1a   : > { %898 = vmatprep.subr.bf16.mxu0 %v934_v47 }
  0x1d   : > { %899 = vmatpush3.bf16.msra.mxu0 %v934_v47 }
  0x20   : > { %881 = vmatmul.mubr.msk.bf16.gmra.mxu0 %vm232_vm2, %v212_v16 }
  0xd8   : > { %v878_v20 = vpop.f32.mrf.mxu0 }
  0xd9   : > { %v295_v26 = vadd.f32 %v878_v20, %v807_v22 }
  0xda   : > { %v286_v21 = vpop.f32.mrf.mxu0 }
  0xdb   : > { %v287_v24 = vadd.f32 %v807_v22, %v286_v21  ;;  %v318_v33 = vmax.f32 %v295_v26, 0.0 }
  0xdc   : > { %v879_v23 = vpop.f32.mrf.mxu0 }
  0xdd   : > { %v298_v25 = vadd.f32 %v879_v23, %v807_v22  ;;  %v316_v31 = vmax.f32 %v287_v24, 0.0 }
  0xde   : > { %v289_v27 = vpop.f32.mrf.mxu0 }
  0xdf   : > { %v290_v28 = vadd.f32 %v807_v22, %v289_v27  ;;  %v319_v29 = vmax.f32 %v298_v25, 0.0 }
  0xe0   : > { %v882_v30 = vpop.f32.mrf.mxu0 }
  0xe1   : > { %v317_v32 = vmax.f32 %v290_v28, 0.0  ;;  %v324_v36 = vpack.c.bf16 %v319_v29, %v318_v33  ;;  %v311_v37 = vadd.f32 %v882_v30, %v807_v22 }
  0xe2   : > { %v302_v34 = vpop.f32.mrf.mxu0 }
  0xe3   : > { %v323_v35 = vpack.c.bf16 %v317_v32, %v316_v31  ;;  %v303_v39 = vadd.f32 %v807_v22, %v302_v34  ;;  %v322_v42 = vmax.f32 %v311_v37, 0.0 }
  0xe4   : > { %v883_v38 = vpop.f32.mrf.mxu0 }
  0xe5   : > { %888 = vmatprep.mubr.msk.bf16.mxu1 %vm351_vm3, %v323_v35  ;;  %v320_v43 = vmax.f32 %v303_v39, 0.0  ;;  %v326_v46 = vpack.c.bf16 %v322_v42, %v322_v42 }
  0xe6   : > { %v305_v40 = vpop.f32.mrf.mxu0  ;;  %889 = vmatmul.mubr.msk.bf16.vlgmr.msra.gmra.mxu1 %vm351_vm3, %v324_v36 }
  0xe7   : > { %v306_v41 = vadd.f32 %v807_v22, %v305_v40  ;;  %909 = vmatpush3.bf16.msra.mxu1 %v935_v48  ;;  %v839_v40 = vld [vmem:[%s1123_s3 + $0x3] ss:$0 sm:$0xff] }
  0xe8   : > { %910 = vmatprep.subr.bf16.mxu1 %v936_v12 }
  0xe9   : > { %v321_v44 = vmax.f32 %v306_v41, 0.0 }
  0xeb   : > { %v325_v45 = vpack.c.bf16 %v321_v44, %v320_v43  ;;  %911 = vmatpush3.bf16.msra.mxu1 %v936_v12 }
  0xed   : > { %892 = vmatprep.mubr.msk.bf16.mxu1 %vm351_vm3, %v325_v45 }
  0xee   : > { %893 = vmatmul.mubr.msk.bf16.gmra.mxu1 %vm351_vm3, %v326_v46 }
 0x1a6   : > { %v890_v49 = vpop.f32.mrf.mxu1 }
 0x1a7   : > { %v407_v55 = vadd.f32 %v890_v49, %v815_v51 }
 0x1a8   : > { %v398_v50 = vpop.f32.mrf.mxu1 }
 0x1a9   : > { %v399_v53 = vadd.f32 %v815_v51, %v398_v50  ;;  %v430_v62 = vmax.f32 %v407_v55, 0.0 }
 0x1aa   : > { %v891_v52 = vpop.f32.mrf.mxu1 }
 0x1ab   : > { %v410_v54 = vadd.f32 %v891_v52, %v815_v51  ;;  %v428_v60 = vmax.f32 %v399_v53, 0.0 }
 0x1ac   : > { %v401_v56 = vpop.f32.mrf.mxu1 }
 0x1ad   : > { %v402_v57 = vadd.f32 %v815_v51, %v401_v56  ;;  %v431_v58 = vmax.f32 %v410_v54, 0.0 }
 0x1ae   : > { %v894_v59 = vpop.f32.mrf.mxu1 }
 0x1af   : > { %v429_v61 = vmax.f32 %v402_v57, 0.0  ;;  %v436_v1 = vpack.c.bf16 %v431_v58, %v430_v62  ;;  %v423_v2 = vadd.f32 %v894_v59, %v815_v51 }
 0x1b0   : > { %v414_v63 = vpop.f32.mrf.mxu1 }
 0x1b1   : > { %v435_v0 = vpack.c.bf16 %v429_v61, %v428_v60  ;;  %v415_v4 = vadd.f32 %v815_v51, %v414_v63  ;;  %v434_v7 = vmax.f32 %v423_v2, 0.0 }
 0x1b2   : > { %v895_v3 = vpop.f32.mrf.mxu1 }
 0x1b3   : > { %900 = vmatprep.mubr.msk.bf16.mxu0 %vm351_vm3, %v435_v0  ;;  %v432_v8 = vmax.f32 %v415_v4, 0.0  ;;  %v438_v11 = vpack.c.bf16 %v434_v7, %v434_v7 }
 0x1b4   : > { %v417_v5 = vpop.f32.mrf.mxu1  ;;  %901 = vmatmul.mubr.msk.bf16.vlgmr.msra.gmra.mxu0 %vm351_vm3, %v436_v1 }
 0x1b5   : > { %v418_v6 = vadd.f32 %v815_v51, %v417_v5 }
 0x1b7   : > { %v433_v9 = vmax.f32 %v418_v6, 0.0 }
 0x1b9   : > { %v437_v10 = vpack.c.bf16 %v433_v9, %v432_v8 }
 0x1bb   : > { %904 = vmatprep.mubr.msk.bf16.mxu0 %vm351_vm3, %v437_v10 }
 0x1bc   : > { %905 = vmatmul.mubr.msk.bf16.gmra.mxu0 %vm351_vm3, %v438_v11 }
 0x274   : > { %v902_v13 = vpop.f32.mrf.mxu0 }
 0x275   : > { %v519_v19 = vadd.f32 %v902_v13, %v827_v15 }
 0x276   : > { %v510_v14 = vpop.f32.mrf.mxu0 }
 0x277   : > { %v511_v17 = vadd.f32 %v827_v15, %v510_v14  ;;  %v542_v26 = vmax.f32 %v519_v19, 0.0 }
 0x278   : > { %v903_v16 = vpop.f32.mrf.mxu0 }
 0x279   : > { %v522_v18 = vadd.f32 %v903_v16, %v827_v15  ;;  %v540_v24 = vmax.f32 %v511_v17, 0.0 }
 0x27a   : > { %v513_v20 = vpop.f32.mrf.mxu0 }
 0x27b   : > { %v514_v21 = vadd.f32 %v827_v15, %v513_v20  ;;  %v543_v22 = vmax.f32 %v522_v18, 0.0 }
 0x27c   : > { %v906_v23 = vpop.f32.mrf.mxu0 }
 0x27d   : > { %v541_v25 = vmax.f32 %v514_v21, 0.0  ;;  %v548_v29 = vpack.c.bf16 %v543_v22, %v542_v26  ;;  %v535_v30 = vadd.f32 %v906_v23, %v827_v15 }
 0x27e   : > { %v526_v27 = vpop.f32.mrf.mxu0 }
 0x27f   : > { %v547_v28 = vpack.c.bf16 %v541_v25, %v540_v24  ;;  %v527_v32 = vadd.f32 %v827_v15, %v526_v27  ;;  %v546_v35 = vmax.f32 %v535_v30, 0.0 }
 0x280   : > { %v907_v31 = vpop.f32.mrf.mxu0 }
 0x281   : > { %912 = vmatprep.mubr.msk.bf16.mxu1 %vm351_vm3, %v547_v28  ;;  %v544_v36 = vmax.f32 %v527_v32, 0.0  ;;  %v550_v39 = vpack.c.bf16 %v546_v35, %v546_v35 }
 0x282   : > { %v529_v33 = vpop.f32.mrf.mxu0  ;;  %913 = vmatmul.mubr.msk.bf16.vlgmr.msra.gmra.mxu1 %vm351_vm3, %v548_v29 }
 0x283   : > { %v530_v34 = vadd.f32 %v827_v15, %v529_v33 }
 0x285   : > { %v545_v37 = vmax.f32 %v530_v34, 0.0 }
 0x287   : > { %v549_v38 = vpack.c.bf16 %v545_v37, %v544_v36 }
 0x289   : > { %916 = vmatprep.mubr.msk.bf16.mxu1 %vm351_vm3, %v549_v38 }
 0x28a   : > { %917 = vmatmul.mubr.msk.bf16.gmra.mxu1 %vm351_vm3, %v550_v39 }
 0x342   : > { %v914_v41 = vpop.f32.mrf.mxu1 }
 0x343   : > { %v631_v42 = vadd.f32 %v914_v41, %v839_v40 }
 0x344   : > { %v622_v43 = vpop.f32.mrf.mxu1 }
 0x345   : > { %v623_v44 = vadd.f32 %v839_v40, %v622_v43  ;;  %v659_v45 = vsel %vm652_vm4, %v631_v42, -inf }
 0x346   : > { %660 = vmax.xlane.f32.xlu1 %v659_v45  ;;  %v915_v46 = vpop.f32.mrf.mxu1 }
 0x347   : > { %v634_v47 = vadd.f32 %v915_v46, %v839_v40  ;;  %v653_v48 = vsel %vm652_vm4, %v623_v44, -inf }
 0x348   : > { %v625_v49 = vpop.f32.mrf.mxu1  ;;  %654 = vmax.xlane.f32.xlu0 %v653_v48 }
 0x349   : > { %v626_v50 = vadd.f32 %v839_v40, %v625_v49  ;;  %v662_v51 = vsel %vm652_vm4, %v634_v47, -inf }
 0x34a   : > { %663 = vmax.xlane.f32.xlu1 %v662_v51  ;;  %v918_v52 = vpop.f32.mrf.mxu1 }
 0x34b   : > { %v656_v53 = vsel %vm652_vm4, %v626_v50, -inf  ;;  %v647_v57 = vadd.f32 %v918_v52, %v839_v40 }
 0x34c   : > { %v638_v54 = vpop.f32.mrf.mxu1  ;;  %657 = vmax.xlane.f32.xlu0 %v656_v53 }
 0x34d   : > { %v639_v55 = vadd.f32 %v839_v40, %v638_v54  ;;  %v671_v62 = vsel %vm652_vm4, %v647_v57, -inf }
 0x34e   : > { %v919_v56 = vpop.f32.mrf.mxu1 }
 0x34f   : > { %v665_v58 = vsel %vm652_vm4, %v639_v55, -inf }
 0x350   : > { %v641_v59 = vpop.f32.mrf.mxu1  ;;  %666 = vmax.xlane.f32.xlu0 %v665_v58 }
 0x351   : > { %v642_v60 = vadd.f32 %v839_v40, %v641_v59 }
 0x353   : > { %v668_v61 = vsel %vm652_vm4, %v642_v60, -inf }
 0x354   : > { %669 = vmax.xlane.f32.xlu1 %v668_v61  ;;  %672 = vmax.xlane.f32.xlu0 %v671_v62 }
 0x3cf   : > { %v661_v63 = vpop.xlane.xlu1 %660 }
 0x3d0   : > { %v1070_v0 = vsub.f32 %v631_v42, %v661_v63 }
 0x3d1   : > { %v655_v1 = vpop.xlane.xlu0 %654 }
 0x3d2   : > { %v685_v2 = vmul.f32 1.442695, %v1070_v0  ;;  %v1073_v3 = vsub.f32 %v623_v44, %v655_v1 }
 0x3d3   : > { %v664_v4 = vpop.xlane.xlu1 %663 }
 0x3d4   : > { %937 = vpow2.f32 %v685_v2  ;;  %v681_v5 = vmul.f32 1.442695, %v1073_v3  ;;  %v1076_v6 = vsub.f32 %v634_v47, %v664_v4 }
 0x3d5   : > { %v658_v7 = vpop.xlane.xlu0 %657 }
 0x3d6   : > { %939 = vpow2.f32 %v681_v5  ;;  %v687_v8 = vmul.f32 1.442695, %v1076_v6  ;;  %v1079_v9 = vsub.f32 %v626_v50, %v658_v7 }
 0x3d8   : > { %941 = vpow2.f32 %v687_v8  ;;  %v683_v10 = vmul.f32 1.442695, %v1079_v9 }
 0x3d9   : > { %v667_v11 = vpop.xlane.xlu0 %666 }
 0x3da   : > { %943 = vpow2.f32 %v683_v10  ;;  %v1082_v12 = vsub.f32 %v639_v55, %v667_v11 }
 0x3dc   : > { %v689_v13 = vmul.f32 1.442695, %v1082_v12 }
 0x3dd   : > { %v670_v14 = vpop.xlane.xlu1 %669  ;;  %v673_v15 = vpop.xlane.xlu0 %672 }
 0x3de   : > { %945 = vpow2.f32 %v689_v13  ;;  %v1085_v16 = vsub.f32 %v642_v60, %v670_v14  ;;  %v1087_v17 = vsub.f32 %v647_v57, %v673_v15 }
 0x3e0   : > { %v691_v18 = vmul.f32 1.442695, %v1085_v16  ;;  %v693_v19 = vmul.f32 1.442695, %v1087_v17 }
 0x3e1   : > { %v938_v20 = vpop.eup %937 }
 0x3e2   : > { %947 = vpow2.f32 %v691_v18  ;;  %v701_v21 = vsel %vm652_vm4, %v938_v20, 0.0 }
 0x3e3   : > { %v940_v22 = vpop.eup %939  ;;  %949 = vpow2.f32 %v693_v19  ;;  %702 = vadd.xlane.f32.xlu1 %v701_v21 }
 0x3e4   : > { %v695_v25 = vsel %vm652_vm4, %v940_v22, 0.0 }
 0x3e5   : > { %v942_v23 = vpop.eup %941 }
 0x3e6   : > { %v704_v24 = vsel %vm652_vm4, %v942_v23, 0.0 }
 0x3e7   : > { %v944_v26 = vpop.eup %943  ;;  %705 = vadd.xlane.f32.xlu0 %v704_v24  ;;  %696 = vadd.xlane.f32.xlu1 %v695_v25 }
 0x3e8   : > { %v698_v27 = vsel %vm652_vm4, %v944_v26, 0.0 }
 0x3eb   : > { %v946_v28 = vpop.eup %945  ;;  %699 = vadd.xlane.f32.xlu0 %v698_v27 }
 0x3ec   : > { %v707_v29 = vsel %vm652_vm4, %v946_v28, 0.0 }
 0x3ed   : > { %708 = vadd.xlane.f32.xlu1 %v707_v29 }
 0x3ef   : > { %v948_v30 = vpop.eup %947 }
 0x3f0   : > { %v950_v31 = vpop.eup %949  ;;  %v710_v32 = vsel %vm652_vm4, %v948_v30, 0.0 }
 0x3f1   : > { %711 = vadd.xlane.f32.xlu0 %v710_v32  ;;  %v713_v33 = vsel %vm652_vm4, %v950_v31, 0.0 }
 0x3f2   : > { %714 = vadd.xlane.f32.xlu1 %v713_v33 }
 0x46c   : > { %v703_v34 = vpop.xlane.xlu1 %702 }
 0x46d   : > { %951 = vlog2.f32 %v703_v34 }
 0x470   : > { %v697_v35 = vpop.xlane.xlu1 %696  ;;  %v706_v36 = vpop.xlane.xlu0 %705 }
 0x471   : > { %953 = vlog2.f32 %v697_v35 }
 0x472   : > { %955 = vlog2.f32 %v706_v36 }
 0x474   : > { %v700_v37 = vpop.xlane.xlu0 %699 }
 0x475   : > { %957 = vlog2.f32 %v700_v37 }
 0x476   : > { %v709_v38 = vpop.xlane.xlu1 %708 }
 0x477   : > { %959 = vlog2.f32 %v709_v38 }
 0x47a   : > { %v952_v39 = vpop.eup %951  ;;  %v712_v40 = vpop.xlane.xlu0 %711 }
 0x47b   : > { %v721_v41 = vmul.f32 0.6931472, %v952_v39  ;;  %v715_v42 = vpop.xlane.xlu1 %714  ;;  %961 = vlog2.f32 %v712_v40 }
 0x47c   : > { %963 = vlog2.f32 %v715_v42 }
 0x47d   : > { %v732_v43 = vsub.f32 %v1070_v0, %v721_v41 }
 0x47e   : > { %v954_v44 = vpop.eup %953 }
 0x47f   : > { %v956_v45 = vpop.eup %955  ;;  %739 = vst.msk [vmem:[%s199_s25 + $0x10] sm:$0xff] %vm652_vm4, %v732_v43  ;;  %v717_v46 = vmul.f32 0.6931472, %v954_v44 }
 0x480   : > { %v723_v47 = vmul.f32 0.6931472, %v956_v45 }
 0x481   : > { %v730_v48 = vsub.f32 %v1073_v3, %v717_v46 }
 0x482   : > { %v958_v49 = vpop.eup %957  ;;  %v733_v50 = vsub.f32 %v1076_v6, %v723_v47 }
 0x483   : > { %737 = vst.msk [vmem:[%s199_s25] sm:$0xff] %vm652_vm4, %v730_v48  ;;  %v719_v51 = vmul.f32 0.6931472, %v958_v49 }
 0x484   : > { %v960_v52 = vpop.eup %959  ;;  %740 = vst.msk [vmem:[%s199_s25 + $0x18] sm:$0xff] %vm652_vm4, %v733_v50 }
 0x485   : > { %v731_v53 = vsub.f32 %v1079_v9, %v719_v51  ;;  %v725_v54 = vmul.f32 0.6931472, %v960_v52 }
 0x487   : > { %738 = vst.msk [vmem:[%s199_s25 + $0x8] sm:$0xff] %vm652_vm4, %v731_v53  ;;  %v734_v55 = vsub.f32 %v1082_v12, %v725_v54 }
 0x488   : > { %v962_v56 = vpop.eup %961 }
 0x489   : > { %v964_v57 = vpop.eup %963  ;;  %741 = vst.msk [vmem:[%s199_s25 + $0x20] sm:$0xff] %vm652_vm4, %v734_v55  ;;  %v727_v58 = vmul.f32 0.6931472, %v962_v56 }
 0x48a   : > { %v729_v59 = vmul.f32 0.6931472, %v964_v57 }
 0x48b   : > { %v735_v60 = vsub.f32 %v1085_v16, %v727_v58 }
 0x48c   : > { %v736_v61 = vsub.f32 %v1087_v17, %v729_v59 }
 0x48d   : > { %742 = vst.msk [vmem:[%s199_s25 + $0x28] sm:$0xff] %vm652_vm4, %v735_v60 }
 0x48e   : > { %743 = vst.msk [vmem:[%s199_s25 + $0x30] sm:$0xff] %vm652_vm4, %v736_v61 }
 0x48f PF: > { %s14_s15 = sadd.s32 1, %s971_s15  }
 0x490   : > { %p11_p4 = scmp.ge.s32.totalorder %s14_s15, 6  }
 0x492   :  { %13 = sbr.rel (!%p11_p4) target bundleno = 1 (0x1), region = 71 }

</bundles_post_ra>
